<compile_context>
chip_gen: v5e
topology: v5e:2x2
jax: 0.10.0
libtpu: 0.0.40
codegen_flags: <defaults>
</compile_context>

<pallas_src>
import functools

import jax
import jax.numpy as jnp
from jax.experimental import pallas as pl
from jax.experimental.pallas import tpu as pltpu

EPS = 1e-5          # nn.BatchNorm1d default eps
HIDDEN = 5          # fixed hidden width of the module
H_PAD = 8           # hidden padded to one sublane group (5 -> 8)


def _round_up(n, m):
    return (n + m - 1) // m * m


# ---------------------------------------------------------------------------
# Kernels
# ---------------------------------------------------------------------------

def _fused_kernel(x_ref, w_ref, gb_ref, o_ref, *, inv_n):
    """Single-tile path (whole batch resident): Linear -> BN(train) -> Sigmoid.

    The Linear bias is never added: training-mode BatchNorm's mean subtraction
    cancels it exactly.
    """
    y = jnp.dot(x_ref[...], w_ref[...], preferred_element_type=jnp.float32)  # (B, 8)

    # One-sweep batch statistics (biased variance, training-mode BN).
    mean = jnp.sum(y, axis=0, keepdims=True) * inv_n
    var = jnp.sum(y * y, axis=0, keepdims=True) * inv_n - mean * mean

    # Fold the BN affine into a single scale/shift.
    scale = gb_ref[0:1, :] * jax.lax.rsqrt(var + EPS)        # gamma row
    shift = gb_ref[1:2, :] - mean * scale                    # beta row
    z = y * scale + shift

    # sigmoid(z) = 0.5*tanh(0.5*z) + 0.5  — single EUP op, exact.
    o_ref[...] = 0.5 * jnp.tanh(0.5 * z) + 0.5


def _stats_kernel(x_ref, w_ref, gb_ref, ss_ref, acc_ref, *, inv_n):
    """Tiled pass 1: accumulate per-feature sum / sum-of-squares of y = x @ W
    over batch tiles; on the last tile fold mean/var and the BN affine into
    (scale, shift)."""
    i = pl.program_id(0)

    @pl.when(i == 0)
    def _init():
        acc_ref[...] = jnp.zeros_like(acc_ref)

    y = jnp.dot(x_ref[...], w_ref[...], preferred_element_type=jnp.float32)  # (TB, 8)
    acc_ref[0:1, :] = acc_ref[0:1, :] + jnp.sum(y, axis=0, keepdims=True)
    acc_ref[1:2, :] = acc_ref[1:2, :] + jnp.sum(y * y, axis=0, keepdims=True)

    @pl.when(i == pl.num_programs(0) - 1)
    def _finalize():
        mean = acc_ref[0:1, :] * inv_n
        var = acc_ref[1:2, :] * inv_n - mean * mean           # biased variance
        scale = gb_ref[0:1, :] * jax.lax.rsqrt(var + EPS)
        shift = gb_ref[1:2, :] - mean * scale
        ss_ref[0:1, :] = scale
        ss_ref[1:2, :] = shift


def _apply_kernel(x_ref, w_ref, ss_ref, o_ref):
    """Tiled pass 2: recompute the tiny matmul per tile (cheaper than spilling
    y to HBM) and apply the folded scale/shift + sigmoid."""
    y = jnp.dot(x_ref[...], w_ref[...], preferred_element_type=jnp.float32)  # (TB, 8)
    z = y * ss_ref[0:1, :] + ss_ref[1:2, :]
    o_ref[...] = 0.5 * jnp.tanh(0.5 * z) + 0.5


# ---------------------------------------------------------------------------
# Wrapper
# ---------------------------------------------------------------------------

def make_net_params(w, gamma, beta):
    """One-time parameter prep (hoisted out of the per-call path):
       * weight padded (F, 5) -> (F, 8),
       * gamma/beta stacked into a single (2, 8) array (one small DMA).
    The nn.Linear bias is intentionally omitted: training-mode BatchNorm
    cancels it exactly."""
    F, H = w.shape
    w_p = jnp.zeros((F, H_PAD), jnp.float32).at[:, :H].set(w.astype(jnp.float32))
    gb = jnp.zeros((2, H_PAD), jnp.float32)
    gb = gb.at[0, :H].set(jnp.reshape(gamma, (-1,)).astype(jnp.float32))
    gb = gb.at[1, :H].set(jnp.reshape(beta, (-1,)).astype(jnp.float32))
    return w_p, gb


@functools.partial(jax.jit, static_argnames=("tile_b",))
def net_forward(x, w_p, gb, tile_b=512):
    """x: (B, F) float32. Returns Sigmoid(BatchNorm1d(Linear(x))) of shape (B, 5)."""
    B, F = x.shape
    x = x.astype(jnp.float32)

    tb = _round_up(min(int(tile_b), _round_up(B, 8)), 8)
    b_pad = _round_up(B, tb)
    if b_pad != B:
        # Zero rows contribute exactly 0 to sum/sumsq (no bias), so statistics
        # stay correct as long as we divide by the true batch size B.
        x = jnp.pad(x, ((0, b_pad - B), (0, 0)))
    n_tiles = b_pad // tb
    inv_n = 1.0 / B

    vmem = pltpu.MemorySpace.VMEM

    if n_tiles == 1:
        # Small batch: single fused launch, whole arrays resident in VMEM.
        out = pl.pallas_call(
            functools.partial(_fused_kernel, inv_n=inv_n),
            out_shape=jax.ShapeDtypeStruct((b_pad, H_PAD), jnp.float32),
            in_specs=[pl.BlockSpec(memory_space=vmem)] * 3,
            out_specs=pl.BlockSpec(memory_space=vmem),
        )(x, w_p, gb)
    else:
        # Large batch (per-pixel use case): batch-tiled two-pass BatchNorm.
        # Pass 1: reduction over batch tiles -> folded (scale, shift).
        scale_shift = pl.pallas_call(
            functools.partial(_stats_kernel, inv_n=inv_n),
            out_shape=jax.ShapeDtypeStruct((2, H_PAD), jnp.float32),
            grid_spec=pltpu.PrefetchScalarGridSpec(
                num_scalar_prefetch=0,
                grid=(n_tiles,),
                in_specs=[
                    pl.BlockSpec((tb, F), lambda i: (i, 0)),
                    pl.BlockSpec((F, H_PAD), lambda i: (0, 0)),
                    pl.BlockSpec((2, H_PAD), lambda i: (0, 0)),
                ],
                out_specs=pl.BlockSpec((2, H_PAD), lambda i: (0, 0)),
                scratch_shapes=[pltpu.VMEM((2, H_PAD), jnp.float32)],
            ),
            compiler_params=pltpu.CompilerParams(
                dimension_semantics=("arbitrary",)),
        )(x, w_p, gb)

        # Pass 2: normalize + sigmoid; batch axis 'parallel' (megacore-shardable).
        out = pl.pallas_call(
            _apply_kernel,
            out_shape=jax.ShapeDtypeStruct((b_pad, H_PAD), jnp.float32),
            grid_spec=pltpu.PrefetchScalarGridSpec(
                num_scalar_prefetch=0,
                grid=(n_tiles,),
                in_specs=[
                    pl.BlockSpec((tb, F), lambda i: (i, 0)),
                    pl.BlockSpec((F, H_PAD), lambda i: (0, 0)),
                    pl.BlockSpec((2, H_PAD), lambda i: (0, 0)),
                ],
                out_specs=pl.BlockSpec((tb, H_PAD), lambda i: (i, 0)),
            ),
            compiler_params=pltpu.CompilerParams(
                dimension_semantics=("parallel",)),
        )(x, w_p, scale_shift)

    return out[:B, :HIDDEN]


if __name__ == "__main__":
    # Shapes consistent with the module: n_feature=16, hidden=5.
    B, F, H = 8, 16, 5

    key = jax.random.PRNGKey(0)
    kx, kw, kb, kx2 = jax.random.split(key, 4)

    x = jax.random.normal(kx, (B, F), dtype=jnp.float32)

    # Parameter init mimicking PyTorch defaults (Linear uniform bound 1/sqrt(F),
    # BatchNorm1d gamma=1 / beta=0).
    bound = 1.0 / (F ** 0.5)
    w = jax.random.uniform(kw, (F, H), minval=-bound, maxval=bound, dtype=jnp.float32)
    b = jax.random.uniform(kb, (1, H), minval=-bound, maxval=bound, dtype=jnp.float32)
    gamma = jnp.ones((1, H), dtype=jnp.float32)
    beta = jnp.zeros((1, H), dtype=jnp.float32)

    # One-time param prep (hoisted out of the per-call path).
    w_p, gb = make_net_params(w, gamma, beta)

    def reference(xv):
        # Bias included here: it is cancelled exactly by the BN mean subtraction.
        y = xv @ w + b
        mean = jnp.mean(y, axis=0, keepdims=True)
        var = jnp.mean((y - mean) ** 2, axis=0, keepdims=True)
        return jax.nn.sigmoid((y - mean) / jnp.sqrt(var + EPS) * gamma + beta)

    # Small batch -> fused single-kernel path.
    out = net_forward(x, w_p, gb)
    jax.block_until_ready(out)
    assert out.shape == (B, H)
    assert jnp.allclose(out, reference(x), atol=1e-4, rtol=1e-4)

    # Larger batch with a small tile -> tiled two-pass BatchNorm path.
    B2 = 32
    x2 = jax.random.normal(kx2, (B2, F), dtype=jnp.float32)
    out2 = net_forward(x2, w_p, gb, tile_b=8)
    jax.block_until_ready(out2)
    assert out2.shape == (B2, H)
    assert jnp.allclose(out2, reference(x2), atol=1e-4, rtol=1e-4)

    print("KERNEL_OK")
</pallas_src>

<mosaic_0001>
module attributes {stable_mosaic.version = 11 : i64} {
  func.func @_fused_kernel(%arg0: memref<8x16xf32, #tpu.memory_space<vmem>>, %arg1: memref<16x8xf32, #tpu.memory_space<vmem>>, %arg2: memref<2x8xf32, #tpu.memory_space<vmem>>, %arg3: memref<8x8xf32, #tpu.memory_space<vmem>>) attributes {dimension_semantics = [], scalar_prefetch = 0 : i64, scratch_operands = 0 : i64, tpu.core_type = #tpu.core_type<tc>} {
    %c0 = arith.constant 0 : index
    %c0_0 = arith.constant 0 : index
    %0 = vector.load %arg0[%c0, %c0_0] : memref<8x16xf32, #tpu.memory_space<vmem>>, vector<8x16xf32>
    %c0_1 = arith.constant 0 : index
    %c0_2 = arith.constant 0 : index
    %1 = vector.load %arg1[%c0_1, %c0_2] : memref<16x8xf32, #tpu.memory_space<vmem>>, vector<16x8xf32>
    %cst = arith.constant dense<0.000000e+00> : vector<8x8xf32>
    %2 = tpu.matmul %0, %1, %cst {dimension_numbers = #tpu.dot_dimension_numbers<[1], [0], [0], [1], [0, 0, 1, 1], [], []>} : vector<8x16xf32>, vector<16x8xf32>, vector<8x8xf32> -> vector<8x8xf32>
    %cst_3 = arith.constant dense<0.000000e+00> : vector<8xf32>
    %3 = vector.multi_reduction <add>, %2, %cst_3 [0] : vector<8x8xf32> to vector<8xf32>
    %4 = vector.shape_cast %3 : vector<8xf32> to vector<1x8xf32>
    %cst_4 = arith.constant 1.250000e-01 : f32
    %5 = vector.broadcast %cst_4 : f32 to vector<1x8xf32>
    %6 = arith.mulf %4, %5 : vector<1x8xf32>
    %7 = arith.mulf %2, %2 : vector<8x8xf32>
    %cst_5 = arith.constant dense<0.000000e+00> : vector<8xf32>
    %8 = vector.multi_reduction <add>, %7, %cst_5 [0] : vector<8x8xf32> to vector<8xf32>
    %9 = vector.shape_cast %8 : vector<8xf32> to vector<1x8xf32>
    %cst_6 = arith.constant 1.250000e-01 : f32
    %10 = vector.broadcast %cst_6 : f32 to vector<1x8xf32>
    %11 = arith.mulf %9, %10 : vector<1x8xf32>
    %12 = arith.mulf %6, %6 : vector<1x8xf32>
    %13 = arith.subf %11, %12 : vector<1x8xf32>
    %c0_7 = arith.constant 0 : index
    %c0_8 = arith.constant 0 : index
    %14 = vector.load %arg2[%c0_7, %c0_8] : memref<2x8xf32, #tpu.memory_space<vmem>>, vector<1x8xf32>
    %cst_9 = arith.constant 9.99999974E-6 : f32
    %15 = vector.broadcast %cst_9 : f32 to vector<1x8xf32>
    %16 = arith.addf %13, %15 : vector<1x8xf32>
    %17 = math.rsqrt %16 : vector<1x8xf32>
    %18 = arith.mulf %14, %17 : vector<1x8xf32>
    %c1 = arith.constant 1 : index
    %c0_10 = arith.constant 0 : index
    %19 = vector.load %arg2[%c1, %c0_10] : memref<2x8xf32, #tpu.memory_space<vmem>>, vector<1x8xf32>
    %20 = arith.mulf %6, %18 : vector<1x8xf32>
    %21 = arith.subf %19, %20 : vector<1x8xf32>
    %22 = vector.broadcast %18 : vector<1x8xf32> to vector<8x8xf32>
    %23 = arith.mulf %2, %22 : vector<8x8xf32>
    %24 = vector.broadcast %21 : vector<1x8xf32> to vector<8x8xf32>
    %25 = arith.addf %23, %24 : vector<8x8xf32>
    %cst_11 = arith.constant 5.000000e-01 : f32
    %26 = vector.broadcast %cst_11 : f32 to vector<8x8xf32>
    %27 = arith.mulf %26, %25 : vector<8x8xf32>
    %28 = math.tanh %27 : vector<8x8xf32>
    %cst_12 = arith.constant 5.000000e-01 : f32
    %29 = vector.broadcast %cst_12 : f32 to vector<8x8xf32>
    %30 = arith.mulf %29, %28 : vector<8x8xf32>
    %cst_13 = arith.constant 5.000000e-01 : f32
    %31 = vector.broadcast %cst_13 : f32 to vector<8x8xf32>
    %32 = arith.addf %30, %31 : vector<8x8xf32>
    %c0_14 = arith.constant 0 : index
    %c0_15 = arith.constant 0 : index
    %33 = vector.load %arg3[%c0_14, %c0_15] : memref<8x8xf32, #tpu.memory_space<vmem>>, vector<8x8xf32>
    tpu.vector_store %arg3[%c0_14, %c0_15], %32 {strides = array<i32>} : memref<8x8xf32, #tpu.memory_space<vmem>>, vector<8x8xf32>,
    return
  }
}

</mosaic_0001>

<bundles_post_ra>
// kernel: net_forward.1
= control target key start
LH: loop header
LB: loop body
LE: loop exit
PB: predicated region body
PF: predicated region fallthrough
CT: control target
= control target key end

     0   :  { %vm18_vm0 = vcmask 130048   ;;  %s177_s0 = inlined_call_operand.vmem [shape: f32[8,16], index: 0, kind: input, shape index: {}]   ;;  %s178_s1 = inlined_call_operand.vmem [shape: f32[16,8], index: 1, kind: input, shape index: {}]   ;;  %s179_s2 = inlined_call_operand.vmem [shape: f32[2,8], index: 2, kind: input, shape index: {}]   ;;  %s180_s3 = inlined_call_operand.hbm [shape: f32[8,8], index: 3, kind: output, shape index: {}]  }
   0x1   :  { %v17_v0 = vld [vmem:[%s178_s1 + $0x8] sm:$0xff]  ;;  %v16_v1 = vld [vmem:[%s178_s1] sm:$0xff] }
   0x2   :  { %36 = vmatpush.msra.mxu0 %v17_v0  ;;  %v15_v2 = vld [vmem:[%s177_s0] sm:$0xff] }
   0x3   :  { %8 = vsyncpa [#allocation3], 0  ;;  %vm42_vm1 = vcmask 64512   ;;  %v62_v29 = vld [vmem:[%s179_s2] sm:$0x1]  ;;  %s135_s20 = smov [#allocation2]  }
   0x4   :  { %37 = vmatpush.msra.mxu0 %v16_v1  ;;  %v75_v33 = vld [vmem:[%s179_s2 + $0x1] sm:$0x1]  ;;  %s92_s21 = sshll.u32 %s135_s20, 4  ;;  %s94_s24 = sshll.u32 %s180_s3, 4  ;;  %s93_s21 = int_to_ptr.vmem [resolvable:$true] %s92_s21  ;;  %s95_s24 = int_to_ptr.hbm [resolvable:$true] %s94_s24 }
   0x5   :  { %103 = vmatmul.msk.f32.vlgmr.msra.gmra.mxu0 %vm18_vm0, %v15_v2 }
  0x82   :  { %v39_v3 = vpop.f32.mrf.mxu0 }
  0x83   :  { %v43_v4 = vsel %vm42_vm1, %v39_v3, 0.0  ;;  %v51_v5 = vmul.f32 %v39_v3, %v39_v3 }
  0x84   :  { %v44_v6 = vrot.slane %v43_v4, 4 }
  0x85   :  { %v52_v7 = vsel %vm42_vm1, %v51_v5, 0.0 }
  0x86   :  { %v45_v8 = vadd.f32 %v44_v6, %v43_v4  ;;  %v53_v9 = vrot.slane %v52_v7, 4 }
  0x88   :  { %v46_v10 = vrot.slane %v45_v8, 2  ;;  %v54_v11 = vadd.f32 %v53_v9, %v52_v7 }
  0x8a   :  { %v47_v12 = vadd.f32 %v46_v10, %v45_v8  ;;  %v55_v13 = vrot.slane %v54_v11, 2 }
  0x8c   :  { %v48_v14 = vrot.slane %v47_v12, 1  ;;  %v56_v15 = vadd.f32 %v55_v13, %v54_v11 }
  0x8e   :  { %v49_v16 = vadd.f32 %v48_v14, %v47_v12  ;;  %v57_v17 = vrot.slane %v56_v15, 1 }
  0x90   :  { %v50_v18 = vmul.f32 0.125, %v49_v16  ;;  %v58_v19 = vadd.f32 %v57_v17, %v56_v15 }
  0x92   :  { %v59_v20 = vmul.f32 0.125, %v58_v19  ;;  %v60_v21 = vmul.f32 %v50_v18, %v50_v18 }
  0x94   :  { %v61_v22 = vsub.f32 %v59_v20, %v60_v21 }
  0x96   :  { %v63_v23 = vadd.f32 1e-05, %v61_v22 }
  0x98   :  { %105 = vrsqrt.f32 %v63_v23  ;;  %vm70_vm3 = vweird.f32 %v63_v23 }
  0x9e   :  { %v106_v24 = vpop.eup %105 }
  0x9f   :  { %v65_v25 = vmul.f32 %v106_v24, %v63_v23  ;;  %vm71_vm2 = vweird.f32 %v106_v24 }
  0xa0   :  { %vm72_vm4 = vmor %vm70_vm3, %vm71_vm2 }
  0xa1   :  { %v66_v26 = vmul.f32 %v106_v24, %v65_v25 }
  0xa3   :  { %v67_v27 = vmul.f32 0.5, %v66_v26 }
  0xa5   :  { %v68_v28 = vsub.f32 1.5, %v67_v27 }
  0xa7   :  { %v69_v30 = vmul.f32 %v106_v24, %v68_v28 }
  0xa9   :  { %v73_v31 = vsel %vm72_vm4, %v106_v24, %v69_v30 }
  0xaa   :  { %v74_v32 = vmul.f32 %v73_v31, %v62_v29 }
  0xac   :  { %v76_v34 = vmul.f32 %v74_v32, %v50_v18  ;;  %v78_v35 = vperm.slane %v74_v32, 0 }
  0xae   :  { %v77_v36 = vsub.f32 %v75_v33, %v76_v34  ;;  %v79_v37 = vmul.f32 %v78_v35, %v39_v3 }
  0xb0   :  { %v80_v38 = vperm.slane %v77_v36, 0 }
  0xb2   :  { %v81_v39 = vadd.f32 %v80_v38, %v79_v37 }
  0xb4   :  { %v82_v40 = vmul.f32 0.5, %v81_v39 }
  0xb6   :  { %107 = vtanh.f32 %v82_v40 }
  0xbc   :  { %v108_v41 = vpop.eup %107 }
  0xbd   :  { %v84_v42 = vmul.f32 0.5, %v108_v41 }
  0xbf   :  { %v85_v43 = vadd.f32 0.5, %v84_v42 }
  0xc1   :  { %86 = vst.msk [vmem:[#allocation2] sm:$0xff] %vm42_vm1, %v85_v43 }
  0xc2   :  { %97 = dma.vmem_to_hbm [thread:$0]  %s93_s21, 128, %s95_s24, [#allocation3]  }
  0xc3   :  { %133 = dma.done.wait [#allocation3], 128  }
  0xc4   :  { %134 = vsyncadd [#allocation3], 4294967168 }
  0xc5   :  { %102 = vsyncpa [#allocation3], 1 }

</bundles_post_ra>
